<compile_context>
chip_gen: v7x
topology: tpu7x:2x2x1
jax: 0.10.0
libtpu: 0.0.40
codegen_flags: <defaults>
</compile_context>

<pallas_src>
import math

import jax
import jax.numpy as jnp
from jax.experimental import pallas as pl
from jax.experimental.pallas import tpu as pltpu


def make_sinusoidal_pe(hidden_dim: int, max_len: int = 500,
                       dtype=jnp.float32) -> jnp.ndarray:
    """Deterministic buffer identical to the PyTorch __init__: (1, max_len, H).

    Handles odd hidden_dim (the naive recipe breaks there): sin fills
    ceil(H/2) columns, cos fills floor(H/2) columns.
    """
    position = jnp.arange(0, max_len, dtype=jnp.float32)[:, None]          # (max_len, 1)
    div_term = jnp.exp(
        jnp.arange(0, hidden_dim, 2, dtype=jnp.float32)
        * (-math.log(10000.0) / hidden_dim)
    )                                                                       # (ceil(H/2),)
    angles = position * div_term                                            # (max_len, ceil(H/2))
    pe = jnp.zeros((max_len, hidden_dim), dtype=jnp.float32)
    n_sin = pe[:, 0::2].shape[1]                                            # ceil(H/2)
    n_cos = pe[:, 1::2].shape[1]                                            # floor(H/2)
    pe = pe.at[:, 0::2].set(jnp.sin(angles[:, :n_sin]))
    pe = pe.at[:, 1::2].set(jnp.cos(angles[:, :n_cos]))
    return pe[None, :, :].astype(dtype)                                     # (1, max_len, H)


def _add_pe_kernel(x_ref, pe_ref, o_ref):
    # x_ref: (TB, TN), pe_ref: (1, TN), o_ref: (TB, TN).
    # Sublane broadcast of the (1, TN) pe tile over the TB rows; dtypes match
    # (pe is pre-cast), cast on store made explicit anyway.
    o_ref[...] = (x_ref[...] + pe_ref[...]).astype(o_ref.dtype)


# VMEM budget for the double-buffered blocks (2x x + 2x out + 2x pe).
_BLOCK_VMEM_BUDGET = 32 * 1024 * 1024   # 32 MiB of blocks
_VMEM_LIMIT_BYTES = 48 * 1024 * 1024    # scoped limit; safe on v7x (64 MiB physical)
_MAX_BATCH_TILE = 256                   # multiple of 8


def _choose_tiles(B: int, N: int, itemsize: int):
    """Pick (TB, TN) so 2*(TB*TN) + 2*(TB*TN) + 2*(1*TN) elems fit the budget."""
    # Batch tile: full batch if modest (full-dim blocks are always legal),
    # otherwise a multiple of 8 (sublane rule); ragged edges are handled.
    tb = B if B <= _MAX_BATCH_TILE else _MAX_BATCH_TILE
    per_tn_bytes = (4 * tb + 2) * itemsize
    tn_max = max(128, (_BLOCK_VMEM_BUDGET // per_tn_bytes) // 128 * 128)
    if N % 128 == 0:
        tn = min(N, tn_max)            # lane-dense multiple of 128
    else:
        # Last-dim rule: must be a multiple of 128 or the full dim -> full dim.
        tn = N
    return tb, tn


def sinusoidal_positional_encoding(x: jnp.ndarray, pe: jnp.ndarray) -> jnp.ndarray:
    """Forward pass: x + pe[:, :seq_len]. x: (B, S, H), pe: (1, max_len, H)."""
    B, S, H = x.shape
    N = S * H

    # Plain-JAX glue (layout plumbing only): lane-dense flattening + dtype match.
    x2 = x.reshape(B, N)
    pe2 = pe[0, :S, :].astype(x.dtype).reshape(1, N)

    tb, tn = _choose_tiles(B, N, x.dtype.itemsize)
    grid = (pl.cdiv(N, tn), pl.cdiv(B, tb))   # pe index constant over inner (batch) axis

    out2 = pl.pallas_call(
        _add_pe_kernel,
        out_shape=jax.ShapeDtypeStruct((B, N), x.dtype),
        grid_spec=pltpu.PrefetchScalarGridSpec(
            num_scalar_prefetch=0,
            grid=grid,
            in_specs=[
                pl.BlockSpec((tb, tn), lambda n, b: (b, n)),   # x tile
                pl.BlockSpec((1, tn), lambda n, b: (0, n)),    # pe tile (shared over batch)
            ],
            out_specs=pl.BlockSpec((tb, tn), lambda n, b: (b, n)),
        ),
        compiler_params=pltpu.CompilerParams(
            dimension_semantics=("parallel", "parallel"),
            vmem_limit_bytes=_VMEM_LIMIT_BYTES,
        ),
    )(x2, pe2)

    return out2.reshape(B, S, H)


if __name__ == "__main__":
    B, S, H = 2, 8, 32
    max_len = 500

    key = jax.random.PRNGKey(0)
    x = jax.random.normal(key, (B, S, H), dtype=jnp.float32)

    pe = make_sinusoidal_pe(H, max_len)

    out = sinusoidal_positional_encoding(x, pe)
    out = jax.block_until_ready(out)

    # Reference check against plain JAX.
    ref = x + pe[:, :S]
    assert out.shape == (B, S, H)
    assert jnp.allclose(out, ref, atol=1e-6), "mismatch vs reference"

    print("KERNEL_OK")
</pallas_src>

<mosaic_0001>
module attributes {stable_mosaic.version = 11 : i64} {
  func.func @_add_pe_kernel(%arg0: i32, %arg1: i32, %arg2: memref<2x256xf32, #tpu.memory_space<vmem>>, %arg3: memref<1x256xf32, #tpu.memory_space<vmem>>, %arg4: memref<2x256xf32, #tpu.memory_space<vmem>>) attributes {dimension_semantics = [#tpu.dimension_semantics<parallel>, #tpu.dimension_semantics<parallel>], iteration_bounds = array<i64: 1, 1>, scalar_prefetch = 0 : i64, scratch_operands = 0 : i64, tpu.core_type = #tpu.core_type<tc>, window_params = [{transform_indices = @transform_0, window_bounds = array<i64: 2, 256>}, {transform_indices = @transform_1, window_bounds = array<i64: 1, 256>}, {transform_indices = @transform_2, window_bounds = array<i64: 2, 256>}]} {
    %c0 = arith.constant 0 : index
    %c0_0 = arith.constant 0 : index
    %0 = vector.load %arg2[%c0, %c0_0] : memref<2x256xf32, #tpu.memory_space<vmem>>, vector<2x256xf32>
    %c0_1 = arith.constant 0 : index
    %c0_2 = arith.constant 0 : index
    %1 = vector.load %arg3[%c0_1, %c0_2] : memref<1x256xf32, #tpu.memory_space<vmem>>, vector<1x256xf32>
    %2 = vector.broadcast %1 : vector<1x256xf32> to vector<2x256xf32>
    %3 = arith.addf %0, %2 : vector<2x256xf32>
    %c0_3 = arith.constant 0 : index
    %c0_4 = arith.constant 0 : index
    %4 = vector.load %arg4[%c0_3, %c0_4] : memref<2x256xf32, #tpu.memory_space<vmem>>, vector<2x256xf32>
    tpu.vector_store %arg4[%c0_3, %c0_4], %3 {strides = array<i32>} : memref<2x256xf32, #tpu.memory_space<vmem>>, vector<2x256xf32>,
    return
  }
  func.func @transform_0(%arg0: i32, %arg1: i32) -> (i32, i32) {
    %c0_i32 = arith.constant 0 : i32
    return %arg1, %arg0 : i32, i32
  }
  func.func @transform_1(%arg0: i32, %arg1: i32) -> (i32, i32) {
    %c0_i32 = arith.constant 0 : i32
    %c0_i32_0 = arith.constant 0 : i32
    return %c0_i32, %arg0 : i32, i32
  }
  func.func @transform_2(%arg0: i32, %arg1: i32) -> (i32, i32) {
    %c0_i32 = arith.constant 0 : i32
    return %arg1, %arg0 : i32, i32
  }
}

</mosaic_0001>

<bundles_post_ra>
// kernel: tpu_custom_call.1
= control target key start
LH: loop header
LB: loop body
LE: loop exit
PB: predicated region body
PF: predicated region fallthrough
CT: control target
= control target key end

     0   :  { %7 = vsyncpa [#allocation3], 0  ;;  %s157_s0 = inlined_call_operand.hbm [shape: f32[2,256], index: 0, kind: input, shape index: {}]   ;;  %s158_s1 = inlined_call_operand.vmem [shape: f32[1,256], index: 1, kind: input, shape index: {}]   ;;  %s159_s2 = inlined_call_operand.hbm [shape: f32[2,256], index: 2, kind: output, shape index: {}]  }
   0x1   :  { %8 = vsyncpa [#allocation4], 0  ;;  %s112_s9 = smov [#allocation2]   ;;  %s64_s13 = scalar_lea.hbm %s157_s0, 64 }
   0x2   :  { %s15_s10 = sshll.u32 %s112_s9, 4  ;;  %p65_p0 = scmp.ne.s32.totalorder %s157_s0, %s64_s13  ;;  %s16_s10 = int_to_ptr.vmem [resolvable:$true] %s15_s10 }
   0x3   :  { %p68_p1 = scmp.lt.u32.totalorder %s64_s13, %s157_s0 }
   0x5   :  { %p70_p2 = pnand %p68_p1, %p65_p0 }
   0x7   :  { %73 = shalt.err (!%p70_p2)
}
   0x8   :  { %s74_s18 = scalar_lea.vmem %s16_s10, 64  ;;  %p79_p4 = scmp.lt.s32.totalorder %s16_s10, %s16_s10 }
   0x9   :  { %p75_p3 = scmp.ne.s32.totalorder %s16_s10, %s74_s18  ;;  %p80_p5 = scmp.lt.s32.totalorder %s74_s18, %s74_s18 }
   0xb   :  { %p81_p6 = por %p80_p5, %p79_p4 }
   0xd   :  { %p82_p7 = pnand %p81_p6, %p75_p3 }
   0xf   :  { %85 = shalt.err (!%p82_p7)
}
  0x10   :  { %18 = dma.hbm_to_vmem [thread:$0]  %s157_s0, 64, %s16_s10, [#allocation3]  }
  0x11   :  { %108 = dma.done.wait [#allocation3], 64  }
  0x12   :  { %109 = vsyncadd [#allocation3], 4294967232  ;;  %v27_v0 = vlaneseq  ;;  %v113_v1 = vmov 1983009808   ;;  %v25_v7 = vld [vmem:[%s158_s1] sm:$0x3] }
  0x13   :  { %v37_v2 = vunpack.c.l.s4 %v113_v1  ;;  %v24_v12 = vld [vmem:[#allocation2] sm:$0xf]  ;;  %s114_s23 = smov [#allocation5]  }
  0x14   :  { %v28_v3 = vshrl.u32 %v27_v0, 7  ;;  %s52_s0 = sshll.u32 %s114_s23, 4  ;;  %s53_s0 = int_to_ptr.vmem [resolvable:$true] %s52_s0 }
  0x15   :  { %v38_v6 = vunpack.c.0.s8 %v37_v2  ;;  %s86_s24 = scalar_lea.vmem %s53_s0, 64  ;;  %p91_p9 = scmp.lt.s32.totalorder %s53_s0, %s53_s0 }
  0x16   :  { %v29_v4 = vsub.s32 0, %v28_v3  ;;  %v33_v5 = vsub.s32 1, %v28_v3  ;;  %p87_p8 = scmp.ne.s32.totalorder %s53_s0, %s86_s24  ;;  %p92_p10 = scmp.lt.s32.totalorder %s86_s24, %s86_s24 }
  0x17   :  { %v41_v10 = vsub.s32 %v38_v6, %v28_v3 }
  0x18   :  { %v30_v8 = vrot.slane %v25_v7, %v29_v4  ;;  %v34_v9 = vrot.slane %v25_v7, %v33_v5  ;;  %p93_p11 = por %p92_p10, %p91_p9 }
  0x1a   :  { %v35_v11 = vcombine.low %v30_v8, %v34_v9  ;;  %p94_p12 = pnand %p93_p11, %p87_p8 }
  0x1c   :  { %v42_v13 = vrot.slane %v35_v11, %v41_v10 }
  0x1e   :  { %v44_v14 = vadd.f32 %v42_v13, %v24_v12 }
  0x20   :  { %45 = vst [vmem:[#allocation5] sm:$0xf] %v44_v14 }
  0x21   :  { %97 = shalt.err (!%p94_p12)
}
  0x22   :  { %s98_s26 = scalar_lea.hbm %s159_s2, 64 }
  0x23   :  { %p99_p13 = scmp.ne.s32.totalorder %s159_s2, %s98_s26  ;;  %p102_p0 = scmp.lt.u32.totalorder %s98_s26, %s159_s2 }
  0x25   :  { %p104_p1 = pnand %p102_p0, %p99_p13 }
  0x27   :  { %107 = shalt.err (!%p104_p1)
}
  0x28   :  { %55 = dma.vmem_to_hbm [thread:$0]  %s53_s0, 64, %s159_s2, [#allocation4]  }
  0x29   :  { %110 = dma.done.wait [#allocation4], 64  }
  0x2a   :  { %111 = vsyncadd [#allocation4], 4294967232 }
  0x2b   :  { %59 = vsyncpa [#allocation3], 1 }
  0x2c   :  { %60 = vsyncpa [#allocation4], 1 }

</bundles_post_ra>
